<compile_context>
chip_gen: v7x
topology: tpu7x:2x2x1
jax: 0.10.0
libtpu: 0.0.40
codegen_flags: <defaults>
</compile_context>

<pallas_src>
import functools

import jax
import jax.numpy as jnp
from jax import lax
from jax.experimental import pallas as pl
from jax.experimental.pallas import tpu as pltpu


# ----------------------------- Pallas kernels -------------------------------

def _matmul_bias_act_kernel(p_ref, w_ref, b_ref, o_ref, acc_ref, *, relu):
    """out = act(patches @ weights + bias), accumulated over the K grid axis."""
    k = pl.program_id(2)

    @pl.when(k == 0)
    def _():
        acc_ref[...] = jnp.zeros_like(acc_ref)

    acc_ref[...] += jnp.dot(p_ref[...], w_ref[...],
                            preferred_element_type=jnp.float32)

    @pl.when(k == pl.num_programs(2) - 1)
    def _():
        out = acc_ref[...] + b_ref[...]
        if relu:
            out = jnp.maximum(out, 0.0)
        o_ref[...] = out.astype(o_ref.dtype)


def _matmul_shortcut_relu_kernel(p_ref, w_ref, ps_ref, ws_ref, b_ref,
                                 o_ref, acc_ref):
    """out = relu(p @ w + ps @ ws + bias): conv2+bn2 fused with 1x1 shortcut."""
    k = pl.program_id(2)

    @pl.when(k == 0)
    def _():
        # Small 1x1-shortcut matmul initializes the accumulator.
        acc_ref[...] = jnp.dot(ps_ref[...], ws_ref[...],
                               preferred_element_type=jnp.float32)

    acc_ref[...] += jnp.dot(p_ref[...], w_ref[...],
                            preferred_element_type=jnp.float32)

    @pl.when(k == pl.num_programs(2) - 1)
    def _():
        o_ref[...] = jnp.maximum(acc_ref[...] + b_ref[...],
                                 0.0).astype(o_ref.dtype)


def _matmul_residual_relu_kernel(p_ref, w_ref, r_ref, b_ref, o_ref, acc_ref):
    """out = relu(p @ w + bias + residual): conv2+bn2 with identity shortcut."""
    k = pl.program_id(2)

    @pl.when(k == 0)
    def _():
        acc_ref[...] = r_ref[...].astype(jnp.float32)

    acc_ref[...] += jnp.dot(p_ref[...], w_ref[...],
                            preferred_element_type=jnp.float32)

    @pl.when(k == pl.num_programs(2) - 1)
    def _():
        o_ref[...] = jnp.maximum(acc_ref[...] + b_ref[...],
                                 0.0).astype(o_ref.dtype)


# --------------------------- pallas_call wrappers ----------------------------

_COMPILER_PARAMS = pltpu.CompilerParams(
    dimension_semantics=("parallel", "parallel", "arbitrary"),
    # Larger tiles (up to ~16 MiB with double buffering) exceed v5e's 16 MiB
    # scoped default; this is a cap (actual use is far below v7x's 64 MiB).
    vmem_limit_bytes=48 * 1024 * 1024)


def _round_up(x, m):
    return (x + m - 1) // m * m


def _pick_tiles(M, N, K):
    """Tile sizes + padded extents. Output lanes stay multiples of 128."""
    # --- M tile: as big as useful, but keep >=2 blocks when M is large so
    #     both v7x TensorCores get work on the 'parallel' i axis.
    Mp8 = _round_up(M, 8)
    if Mp8 <= 512:
        tm = Mp8
    elif Mp8 <= 2048:
        tm = _round_up((Mp8 + 1) // 2, 8)
    else:
        tm = 1024
    Mp = _round_up(Mp8, tm)

    # --- N tile: a multiple-of-128 divisor of the padded N, capped at 512.
    Np = _round_up(N, 128)
    tn = 128
    for cand in (512, 384, 256, 128):
        if cand <= Np and Np % cand == 0:
            tn = cand
            break

    # --- K tile: pad K only to 128.  Single K block when it fits comfortably
    #     in VMEM, otherwise a multiple-of-128 divisor (no zero-K waste).
    Kp = _round_up(K, 128)
    if Kp <= 1536:
        tk = Kp
    else:
        tk = 128
        for cand in (512, 384, 256, 128):
            if Kp % cand == 0:
                tk = cand
                break
    return tm, tn, tk, Mp, Np, Kp


def _pad2(a, rows, cols):
    return jnp.pad(a, ((0, rows - a.shape[0]), (0, cols - a.shape[1])))


def _conv_bn_matmul(patches, wmat, bias, *, relu):
    """(M,K) x (K,N) + bias[1,N], optional ReLU. Returns (M,N) bf16."""
    M, K = patches.shape
    N = wmat.shape[1]
    tm, tn, tk, Mp, Np, Kp = _pick_tiles(M, N, K)

    p = _pad2(patches.astype(jnp.bfloat16), Mp, Kp)
    w = _pad2(wmat.astype(jnp.bfloat16), Kp, Np)
    b = _pad2(bias.reshape(1, -1).astype(jnp.float32), 1, Np)

    out = pl.pallas_call(
        functools.partial(_matmul_bias_act_kernel, relu=relu),
        out_shape=jax.ShapeDtypeStruct((Mp, Np), jnp.bfloat16),
        grid_spec=pltpu.PrefetchScalarGridSpec(
            num_scalar_prefetch=0,
            grid=(Mp // tm, Np // tn, Kp // tk),
            in_specs=[
                pl.BlockSpec((tm, tk), lambda i, j, k: (i, k)),
                pl.BlockSpec((tk, tn), lambda i, j, k: (k, j)),
                pl.BlockSpec((1, tn), lambda i, j, k: (0, j)),
            ],
            out_specs=pl.BlockSpec((tm, tn), lambda i, j, k: (i, j)),
            scratch_shapes=[pltpu.VMEM((tm, tn), jnp.float32)],
        ),
        compiler_params=_COMPILER_PARAMS,
        cost_estimate=pl.CostEstimate(
            flops=2 * Mp * Np * Kp,
            transcendentals=0,
            bytes_accessed=(p.size + w.size) * 2 + b.size * 4 + Mp * Np * 2),
    )(p, w, b)
    return out[:M, :N]


def _conv_bn_shortcut_relu_matmul(patches, wmat, sc_patches, sc_wmat, bias):
    """relu(p @ w + ps @ ws + bias): conv2 with fused 1x1 conv shortcut."""
    M, K = patches.shape
    N = wmat.shape[1]
    Ks = sc_patches.shape[1]
    tm, tn, tk, Mp, Np, Kp = _pick_tiles(M, N, K)
    Ksp = _round_up(Ks, 128)

    p = _pad2(patches.astype(jnp.bfloat16), Mp, Kp)
    w = _pad2(wmat.astype(jnp.bfloat16), Kp, Np)
    ps = _pad2(sc_patches.astype(jnp.bfloat16), Mp, Ksp)
    ws = _pad2(sc_wmat.astype(jnp.bfloat16), Ksp, Np)
    b = _pad2(bias.reshape(1, -1).astype(jnp.float32), 1, Np)

    out = pl.pallas_call(
        _matmul_shortcut_relu_kernel,
        out_shape=jax.ShapeDtypeStruct((Mp, Np), jnp.bfloat16),
        grid_spec=pltpu.PrefetchScalarGridSpec(
            num_scalar_prefetch=0,
            grid=(Mp // tm, Np // tn, Kp // tk),
            in_specs=[
                pl.BlockSpec((tm, tk), lambda i, j, k: (i, k)),
                pl.BlockSpec((tk, tn), lambda i, j, k: (k, j)),
                pl.BlockSpec((tm, Ksp), lambda i, j, k: (i, 0)),
                pl.BlockSpec((Ksp, tn), lambda i, j, k: (0, j)),
                pl.BlockSpec((1, tn), lambda i, j, k: (0, j)),
            ],
            out_specs=pl.BlockSpec((tm, tn), lambda i, j, k: (i, j)),
            scratch_shapes=[pltpu.VMEM((tm, tn), jnp.float32)],
        ),
        compiler_params=_COMPILER_PARAMS,
        cost_estimate=pl.CostEstimate(
            flops=2 * Mp * Np * (Kp + Ksp),
            transcendentals=0,
            bytes_accessed=(p.size + w.size + ps.size + ws.size) * 2
                           + b.size * 4 + Mp * Np * 2),
    )(p, w, ps, ws, b)
    return out[:M, :N]


def _conv_bn_residual_relu_matmul(patches, wmat, residual, bias):
    """relu(p @ w + bias + residual): conv2 with identity shortcut."""
    M, K = patches.shape
    N = wmat.shape[1]
    tm, tn, tk, Mp, Np, Kp = _pick_tiles(M, N, K)

    p = _pad2(patches.astype(jnp.bfloat16), Mp, Kp)
    w = _pad2(wmat.astype(jnp.bfloat16), Kp, Np)
    r = _pad2(residual.astype(jnp.bfloat16), Mp, Np)   # bf16 residual read
    b = _pad2(bias.reshape(1, -1).astype(jnp.float32), 1, Np)

    out = pl.pallas_call(
        _matmul_residual_relu_kernel,
        out_shape=jax.ShapeDtypeStruct((Mp, Np), jnp.bfloat16),
        grid_spec=pltpu.PrefetchScalarGridSpec(
            num_scalar_prefetch=0,
            grid=(Mp // tm, Np // tn, Kp // tk),
            in_specs=[
                pl.BlockSpec((tm, tk), lambda i, j, k: (i, k)),
                pl.BlockSpec((tk, tn), lambda i, j, k: (k, j)),
                pl.BlockSpec((tm, tn), lambda i, j, k: (i, j)),
                pl.BlockSpec((1, tn), lambda i, j, k: (0, j)),
            ],
            out_specs=pl.BlockSpec((tm, tn), lambda i, j, k: (i, j)),
            scratch_shapes=[pltpu.VMEM((tm, tn), jnp.float32)],
        ),
        compiler_params=_COMPILER_PARAMS,
        cost_estimate=pl.CostEstimate(
            flops=2 * Mp * Np * Kp,
            transcendentals=0,
            bytes_accessed=(p.size + w.size + r.size) * 2 + b.size * 4
                           + Mp * Np * 2),
    )(p, w, r, b)
    return out[:M, :N]


# ------------------------------ JAX glue -------------------------------------

def _im2col(x_nhwc, ksize, stride, pad):
    """Return (B*Ho*Wo, ksize*ksize*C) rows in (kh, kw, c) channel order."""
    B, H, W, C = x_nhwc.shape
    xp = jnp.pad(x_nhwc, ((0, 0), (pad, pad), (pad, pad), (0, 0)))
    Ho = (H + 2 * pad - ksize) // stride + 1
    Wo = (W + 2 * pad - ksize) // stride + 1
    cols = []
    for kh in range(ksize):
        for kw in range(ksize):
            patch = xp[:,
                       kh:kh + (Ho - 1) * stride + 1:stride,
                       kw:kw + (Wo - 1) * stride + 1:stride,
                       :]  # (B, Ho, Wo, C)
            cols.append(patch)
    patches = jnp.concatenate(cols, axis=-1)  # (B, Ho, Wo, k*k*C)
    return patches.reshape(B * Ho * Wo, ksize * ksize * C), Ho, Wo


def _weight_to_mat(w_oihw):
    """PyTorch OIHW conv weight -> (kh*kw*Cin, Cout) matching _im2col order."""
    Cout, Cin, kh, kw = w_oihw.shape
    return jnp.transpose(w_oihw, (2, 3, 1, 0)).reshape(kh * kw * Cin, Cout)


def _fold_bn_into_weight(wmat, gamma, beta, mean, var, eps=1e-5):
    """Fold eval-mode BN into the matmul: (wmat*scale, bias)."""
    scale = gamma / jnp.sqrt(var + eps)          # (Cout,)
    bias = beta - mean * scale                   # (Cout,)
    return wmat * scale[None, :], bias


def basic_block_forward_nhwc(x_nhwc, params, stride):
    """NHWC-in / NHWC-out BasicBlock (chain this form across a ResNet stack)."""
    B, H, W, Cin = x_nhwc.shape
    planes = params["w1"].shape[0]
    has_conv_shortcut = (stride != 1) or (Cin != planes)

    x = x_nhwc.astype(jnp.bfloat16)

    # --- conv1 (3x3, stride) + bn1 + relu ---
    p1, Ho, Wo = _im2col(x, 3, stride, 1)
    w1, b1 = _fold_bn_into_weight(_weight_to_mat(params["w1"]), *params["bn1"])
    out1 = _conv_bn_matmul(p1, w1, b1, relu=True)           # (M, planes) bf16
    out1_nhwc = out1.reshape(B, Ho, Wo, planes)              # free reshape

    # --- conv2 (3x3, stride 1) + bn2 + shortcut + relu, fused ---
    p2, _, _ = _im2col(out1_nhwc, 3, 1, 1)
    w2, b2 = _fold_bn_into_weight(_weight_to_mat(params["w2"]), *params["bn2"])

    if has_conv_shortcut:
        xs = x[:, ::stride, ::stride, :].reshape(B * Ho * Wo, Cin)
        ws, bs = _fold_bn_into_weight(_weight_to_mat(params["ws"]),
                                      *params["bns"])
        out = _conv_bn_shortcut_relu_matmul(p2, w2, xs, ws, b2 + bs)
    else:
        res = x.reshape(B * Ho * Wo, Cin)        # identity shortcut
        out = _conv_bn_residual_relu_matmul(p2, w2, res, b2)

    return out.reshape(B, Ho, Wo, planes)        # NHWC bf16, no transpose


def basic_block_forward(x_nchw, params, stride):
    """Torch-facing NCHW wrapper; layout conversion only at the boundary."""
    x = jnp.transpose(x_nchw, (0, 2, 3, 1))                 # NCHW -> NHWC
    out = basic_block_forward_nhwc(x, params, stride)
    return jnp.transpose(out, (0, 3, 1, 2))                 # NHWC -> NCHW


basic_block_forward_jit = jax.jit(basic_block_forward, static_argnums=(2,))


# ------------------------- pure-JAX reference --------------------------------

def _ref_block(x, params, stride):
    def conv(x, w, s, pad):
        return lax.conv_general_dilated(
            x, w, (s, s), [(pad, pad), (pad, pad)],
            dimension_numbers=("NCHW", "OIHW", "NCHW"))

    def bn(x, stats):
        gamma, beta, mean, var = stats
        s = gamma / jnp.sqrt(var + 1e-5)
        return x * s[None, :, None, None] + (beta - mean * s)[None, :, None, None]

    in_planes = x.shape[1]
    planes = params["w1"].shape[0]
    out = jax.nn.relu(bn(conv(x, params["w1"], stride, 1), params["bn1"]))
    out = bn(conv(out, params["w2"], 1, 1), params["bn2"])
    if stride != 1 or in_planes != planes:
        sc = bn(conv(x, params["ws"], stride, 0), params["bns"])
    else:
        sc = x
    return jax.nn.relu(out + sc)


# ------------------------------- main -----------------------------------------

if __name__ == "__main__":
    key = jax.random.PRNGKey(0)
    ks = jax.random.split(key, 16)

    def bn_params(k, c):
        k1, k2, k3, k4 = jax.random.split(k, 4)
        gamma = 1.0 + 0.1 * jax.random.normal(k1, (c,), jnp.float32)
        beta = 0.1 * jax.random.normal(k2, (c,), jnp.float32)
        mean = 0.1 * jax.random.normal(k3, (c,), jnp.float32)
        var = 0.5 + jnp.abs(jax.random.normal(k4, (c,), jnp.float32))
        return (gamma, beta, mean, var)

    # --- case 1: downsampling block (conv shortcut path) ---
    B, in_planes, planes, H, W, stride = 2, 4, 8, 16, 16, 2
    params = {
        "w1": 0.1 * jax.random.normal(ks[0], (planes, in_planes, 3, 3), jnp.float32),
        "bn1": bn_params(ks[1], planes),
        "w2": 0.1 * jax.random.normal(ks[2], (planes, planes, 3, 3), jnp.float32),
        "bn2": bn_params(ks[3], planes),
        "ws": 0.1 * jax.random.normal(ks[4], (planes, in_planes, 1, 1), jnp.float32),
        "bns": bn_params(ks[5], planes),
    }
    x = jax.random.normal(ks[6], (B, in_planes, H, W), jnp.float32)

    out = jax.block_until_ready(basic_block_forward_jit(x, params, stride))
    ref = jax.block_until_ready(_ref_block(x, params, stride))
    assert out.shape == ref.shape, (out.shape, ref.shape)
    assert jnp.allclose(out.astype(jnp.float32), ref, rtol=5e-2, atol=5e-2), \
        float(jnp.max(jnp.abs(out.astype(jnp.float32) - ref)))

    # --- case 2: identity-shortcut block (stride=1, in_planes==planes) ---
    planes2 = 8
    params2 = {
        "w1": 0.1 * jax.random.normal(ks[7], (planes2, planes2, 3, 3), jnp.float32),
        "bn1": bn_params(ks[8], planes2),
        "w2": 0.1 * jax.random.normal(ks[9], (planes2, planes2, 3, 3), jnp.float32),
        "bn2": bn_params(ks[10], planes2),
    }
    x2 = jax.random.normal(ks[11], (B, planes2, H, W), jnp.float32)

    out2 = jax.block_until_ready(basic_block_forward_jit(x2, params2, 1))
    ref2 = jax.block_until_ready(_ref_block(x2, params2, 1))
    assert out2.shape == ref2.shape, (out2.shape, ref2.shape)
    assert jnp.allclose(out2.astype(jnp.float32), ref2, rtol=5e-2, atol=5e-2), \
        float(jnp.max(jnp.abs(out2.astype(jnp.float32) - ref2)))

    print("KERNEL_OK")
</pallas_src>

<mosaic_0001>
module attributes {stable_mosaic.version = 11 : i64} {
  func.func @_matmul_bias_act_kernel(%arg0: i32, %arg1: i32, %arg2: i32, %arg3: memref<128x128xbf16, #tpu.memory_space<vmem>>, %arg4: memref<128x128xbf16, #tpu.memory_space<vmem>>, %arg5: memref<1x128xf32, #tpu.memory_space<vmem>>, %arg6: memref<128x128xbf16, #tpu.memory_space<vmem>>, %arg7: memref<128x128xf32, #tpu.memory_space<vmem>>) attributes {dimension_semantics = [#tpu.dimension_semantics<parallel>, #tpu.dimension_semantics<parallel>, #tpu.dimension_semantics<arbitrary>], iteration_bounds = array<i64: 1, 1, 1>, scalar_prefetch = 0 : i64, scratch_operands = 1 : i64, tpu.core_type = #tpu.core_type<tc>, window_params = [{transform_indices = @transform_0, window_bounds = array<i64: 128, 128>}, {transform_indices = @transform_1, window_bounds = array<i64: 128, 128>}, {transform_indices = @transform_2, window_bounds = array<i64: 1, 128>}, {transform_indices = @transform_3, window_bounds = array<i64: 128, 128>}]} {
    %c0_i32 = arith.constant 0 : i32
    %0 = arith.cmpi eq, %arg2, %c0_i32 : i32
    %1 = arith.extui %0 : i1 to i32
    %c0_i32_0 = arith.constant 0 : i32
    %2 = arith.cmpi ne, %1, %c0_i32_0 : i32
    scf.if %2 {
      %cst_10 = arith.constant 0.000000e+00 : f32
      %12 = vector.broadcast %cst_10 : f32 to vector<128x128xf32>
      %c0_11 = arith.constant 0 : index
      %c0_12 = arith.constant 0 : index
      %13 = vector.load %arg7[%c0_11, %c0_12] : memref<128x128xf32, #tpu.memory_space<vmem>>, vector<128x128xf32>
      tpu.vector_store %arg7[%c0_11, %c0_12], %12 {strides = array<i32>} : memref<128x128xf32, #tpu.memory_space<vmem>>, vector<128x128xf32>,
    } else {
    }
    %c0 = arith.constant 0 : index
    %c0_1 = arith.constant 0 : index
    %3 = vector.load %arg7[%c0, %c0_1] : memref<128x128xf32, #tpu.memory_space<vmem>>, vector<128x128xf32>
    %c0_2 = arith.constant 0 : index
    %c0_3 = arith.constant 0 : index
    %4 = vector.load %arg3[%c0_2, %c0_3] : memref<128x128xbf16, #tpu.memory_space<vmem>>, vector<128x128xbf16>
    %c0_4 = arith.constant 0 : index
    %c0_5 = arith.constant 0 : index
    %5 = vector.load %arg4[%c0_4, %c0_5] : memref<128x128xbf16, #tpu.memory_space<vmem>>, vector<128x128xbf16>
    %cst = arith.constant dense<0.000000e+00> : vector<128x128xf32>
    %6 = tpu.matmul %4, %5, %cst {dimension_numbers = #tpu.dot_dimension_numbers<[1], [0], [0], [1], [0, 0, 1, 1], [], []>} : vector<128x128xbf16>, vector<128x128xbf16>, vector<128x128xf32> -> vector<128x128xf32>
    %7 = arith.addf %3, %6 : vector<128x128xf32>
    %c0_6 = arith.constant 0 : index
    %c0_7 = arith.constant 0 : index
    %8 = vector.load %arg7[%c0_6, %c0_7] : memref<128x128xf32, #tpu.memory_space<vmem>>, vector<128x128xf32>
    tpu.vector_store %arg7[%c0_6, %c0_7], %7 {strides = array<i32>} : memref<128x128xf32, #tpu.memory_space<vmem>>, vector<128x128xf32>,
    %c0_i32_8 = arith.constant 0 : i32
    %9 = arith.cmpi eq, %arg2, %c0_i32_8 : i32
    %10 = arith.extui %9 : i1 to i32
    %c0_i32_9 = arith.constant 0 : i32
    %11 = arith.cmpi ne, %10, %c0_i32_9 : i32
    scf.if %11 {
      %c0_10 = arith.constant 0 : index
      %c0_11 = arith.constant 0 : index
      %12 = vector.load %arg7[%c0_10, %c0_11] : memref<128x128xf32, #tpu.memory_space<vmem>>, vector<128x128xf32>
      %c0_12 = arith.constant 0 : index
      %c0_13 = arith.constant 0 : index
      %13 = vector.load %arg5[%c0_12, %c0_13] : memref<1x128xf32, #tpu.memory_space<vmem>>, vector<1x128xf32>
      %14 = vector.broadcast %13 : vector<1x128xf32> to vector<128x128xf32>
      %15 = arith.addf %12, %14 : vector<128x128xf32>
      %cst_14 = arith.constant 0.000000e+00 : f32
      %16 = vector.broadcast %cst_14 : f32 to vector<128x128xf32>
      %17 = arith.maximumf %15, %16 : vector<128x128xf32>
      %18 = arith.truncf %17 : vector<128x128xf32> to vector<128x128xbf16>
      %c0_15 = arith.constant 0 : index
      %c0_16 = arith.constant 0 : index
      %19 = vector.load %arg6[%c0_15, %c0_16] : memref<128x128xbf16, #tpu.memory_space<vmem>>, vector<128x128xbf16>
      tpu.vector_store %arg6[%c0_15, %c0_16], %18 {strides = array<i32>} : memref<128x128xbf16, #tpu.memory_space<vmem>>, vector<128x128xbf16>,
    } else {
    }
    return
  }
  func.func @transform_0(%arg0: i32, %arg1: i32, %arg2: i32) -> (i32, i32) {
    %c0_i32 = arith.constant 0 : i32
    return %arg0, %arg2 : i32, i32
  }
  func.func @transform_1(%arg0: i32, %arg1: i32, %arg2: i32) -> (i32, i32) {
    %c0_i32 = arith.constant 0 : i32
    return %arg2, %arg1 : i32, i32
  }
  func.func @transform_2(%arg0: i32, %arg1: i32, %arg2: i32) -> (i32, i32) {
    %c0_i32 = arith.constant 0 : i32
    %c0_i32_0 = arith.constant 0 : i32
    return %c0_i32, %arg1 : i32, i32
  }
  func.func @transform_3(%arg0: i32, %arg1: i32, %arg2: i32) -> (i32, i32) {
    %c0_i32 = arith.constant 0 : i32
    return %arg0, %arg1 : i32, i32
  }
}

module attributes {stable_mosaic.version = 11 : i64} {
  func.func @_matmul_shortcut_relu_kernel(%arg0: i32, %arg1: i32, %arg2: i32, %arg3: memref<128x128xbf16, #tpu.memory_space<vmem>>, %arg4: memref<128x128xbf16, #tpu.memory_space<vmem>>, %arg5: memref<128x128xbf16, #tpu.memory_space<vmem>>, %arg6: memref<128x128xbf16, #tpu.memory_space<vmem>>, %arg7: memref<1x128xf32, #tpu.memory_space<vmem>>, %arg8: memref<128x128xbf16, #tpu.memory_space<vmem>>, %arg9: memref<128x128xf32, #tpu.memory_space<vmem>>) attributes {dimension_semantics = [#tpu.dimension_semantics<parallel>, #tpu.dimension_semantics<parallel>, #tpu.dimension_semantics<arbitrary>], iteration_bounds = array<i64: 1, 1, 1>, scalar_prefetch = 0 : i64, scratch_operands = 1 : i64, tpu.core_type = #tpu.core_type<tc>, window_params = [{transform_indices = @transform_0, window_bounds = array<i64: 128, 128>}, {transform_indices = @transform_1, window_bounds = array<i64: 128, 128>}, {transform_indices = @transform_2, window_bounds = array<i64: 128, 128>}, {transform_indices = @transform_3, window_bounds = array<i64: 128, 128>}, {transform_indices = @transform_4, window_bounds = array<i64: 1, 128>}, {transform_indices = @transform_5, window_bounds = array<i64: 128, 128>}]} {
    %c0_i32 = arith.constant 0 : i32
    %0 = arith.cmpi eq, %arg2, %c0_i32 : i32
    %1 = arith.extui %0 : i1 to i32
    %c0_i32_0 = arith.constant 0 : i32
    %2 = arith.cmpi ne, %1, %c0_i32_0 : i32
    scf.if %2 {
      %c0_10 = arith.constant 0 : index
      %c0_11 = arith.constant 0 : index
      %12 = vector.load %arg5[%c0_10, %c0_11] : memref<128x128xbf16, #tpu.memory_space<vmem>>, vector<128x128xbf16>
      %c0_12 = arith.constant 0 : index
      %c0_13 = arith.constant 0 : index
      %13 = vector.load %arg6[%c0_12, %c0_13] : memref<128x128xbf16, #tpu.memory_space<vmem>>, vector<128x128xbf16>
      %cst_14 = arith.constant dense<0.000000e+00> : vector<128x128xf32>
      %14 = tpu.matmul %12, %13, %cst_14 {dimension_numbers = #tpu.dot_dimension_numbers<[1], [0], [0], [1], [0, 0, 1, 1], [], []>} : vector<128x128xbf16>, vector<128x128xbf16>, vector<128x128xf32> -> vector<128x128xf32>
      %c0_15 = arith.constant 0 : index
      %c0_16 = arith.constant 0 : index
      %15 = vector.load %arg9[%c0_15, %c0_16] : memref<128x128xf32, #tpu.memory_space<vmem>>, vector<128x128xf32>
      tpu.vector_store %arg9[%c0_15, %c0_16], %14 {strides = array<i32>} : memref<128x128xf32, #tpu.memory_space<vmem>>, vector<128x128xf32>,
    } else {
    }
    %c0 = arith.constant 0 : index
    %c0_1 = arith.constant 0 : index
    %3 = vector.load %arg9[%c0, %c0_1] : memref<128x128xf32, #tpu.memory_space<vmem>>, vector<128x128xf32>
    %c0_2 = arith.constant 0 : index
    %c0_3 = arith.constant 0 : index
    %4 = vector.load %arg3[%c0_2, %c0_3] : memref<128x128xbf16, #tpu.memory_space<vmem>>, vector<128x128xbf16>
    %c0_4 = arith.constant 0 : index
    %c0_5 = arith.constant 0 : index
    %5 = vector.load %arg4[%c0_4, %c0_5] : memref<128x128xbf16, #tpu.memory_space<vmem>>, vector<128x128xbf16>
    %cst = arith.constant dense<0.000000e+00> : vector<128x128xf32>
    %6 = tpu.matmul %4, %5, %cst {dimension_numbers = #tpu.dot_dimension_numbers<[1], [0], [0], [1], [0, 0, 1, 1], [], []>} : vector<128x128xbf16>, vector<128x128xbf16>, vector<128x128xf32> -> vector<128x128xf32>
    %7 = arith.addf %3, %6 : vector<128x128xf32>
    %c0_6 = arith.constant 0 : index
    %c0_7 = arith.constant 0 : index
    %8 = vector.load %arg9[%c0_6, %c0_7] : memref<128x128xf32, #tpu.memory_space<vmem>>, vector<128x128xf32>
    tpu.vector_store %arg9[%c0_6, %c0_7], %7 {strides = array<i32>} : memref<128x128xf32, #tpu.memory_space<vmem>>, vector<128x128xf32>,
    %c0_i32_8 = arith.constant 0 : i32
    %9 = arith.cmpi eq, %arg2, %c0_i32_8 : i32
    %10 = arith.extui %9 : i1 to i32
    %c0_i32_9 = arith.constant 0 : i32
    %11 = arith.cmpi ne, %10, %c0_i32_9 : i32
    scf.if %11 {
      %c0_10 = arith.constant 0 : index
      %c0_11 = arith.constant 0 : index
      %12 = vector.load %arg9[%c0_10, %c0_11] : memref<128x128xf32, #tpu.memory_space<vmem>>, vector<128x128xf32>
      %c0_12 = arith.constant 0 : index
      %c0_13 = arith.constant 0 : index
      %13 = vector.load %arg7[%c0_12, %c0_13] : memref<1x128xf32, #tpu.memory_space<vmem>>, vector<1x128xf32>
      %14 = vector.broadcast %13 : vector<1x128xf32> to vector<128x128xf32>
      %15 = arith.addf %12, %14 : vector<128x128xf32>
      %cst_14 = arith.constant 0.000000e+00 : f32
      %16 = vector.broadcast %cst_14 : f32 to vector<128x128xf32>
      %17 = arith.maximumf %15, %16 : vector<128x128xf32>
      %18 = arith.truncf %17 : vector<128x128xf32> to vector<128x128xbf16>
      %c0_15 = arith.constant 0 : index
      %c0_16 = arith.constant 0 : index
      %19 = vector.load %arg8[%c0_15, %c0_16] : memref<128x128xbf16, #tpu.memory_space<vmem>>, vector<128x128xbf16>
      tpu.vector_store %arg8[%c0_15, %c0_16], %18 {strides = array<i32>} : memref<128x128xbf16, #tpu.memory_space<vmem>>, vector<128x128xbf16>,
    } else {
    }
    return
  }
  func.func @transform_0(%arg0: i32, %arg1: i32, %arg2: i32) -> (i32, i32) {
    %c0_i32 = arith.constant 0 : i32
    return %arg0, %arg2 : i32, i32
  }
  func.func @transform_1(%arg0: i32, %arg1: i32, %arg2: i32) -> (i32, i32) {
    %c0_i32 = arith.constant 0 : i32
    return %arg2, %arg1 : i32, i32
  }
  func.func @transform_2(%arg0: i32, %arg1: i32, %arg2: i32) -> (i32, i32) {
    %c0_i32 = arith.constant 0 : i32
    %c0_i32_0 = arith.constant 0 : i32
    return %arg0, %c0_i32 : i32, i32
  }
  func.func @transform_3(%arg0: i32, %arg1: i32, %arg2: i32) -> (i32, i32) {
    %c0_i32 = arith.constant 0 : i32
    %c0_i32_0 = arith.constant 0 : i32
    return %c0_i32, %arg1 : i32, i32
  }
  func.func @transform_4(%arg0: i32, %arg1: i32, %arg2: i32) -> (i32, i32) {
    %c0_i32 = arith.constant 0 : i32
    %c0_i32_0 = arith.constant 0 : i32
    return %c0_i32, %arg1 : i32, i32
  }
  func.func @transform_5(%arg0: i32, %arg1: i32, %arg2: i32) -> (i32, i32) {
    %c0_i32 = arith.constant 0 : i32
    return %arg0, %arg1 : i32, i32
  }
}

</mosaic_0001>

<bundles_post_ra>
// kernel: basic_block_forward.2
= control target key start
LH: loop header
LB: loop body
LE: loop exit
PB: predicated region body
PF: predicated region fallthrough
CT: control target
= control target key end

     0   :  { %s721_s1 = inlined_call_operand.vmem [shape: bf16[128,128], index: 1, kind: input, shape index: {}]   ;;  %s722_s0 = inlined_call_operand.vmem [shape: bf16[128,128], index: 0, kind: input, shape index: {}]   ;;  %s723_s2 = inlined_call_operand.vmem [shape: f32[1,128], index: 2, kind: input, shape index: {}]   ;;  %s724_s3 = inlined_call_operand.vmem [shape: bf16[128,128], index: 3, kind: output, shape index: {}]  }
   0x1   :  { %v610_v0 = vld [vmem:[%s721_s1] sm:$0xff]   ;;  %v611_v1 = vld [vmem:[%s721_s1 + $0x8] sm:$0xff]   ;;  %v612_v2 = vld [vmem:[%s721_s1 + $0x10] sm:$0xff]  }
   0x2   :  { %562 = vmatprep.subr.bf16.mxu0 %v610_v0  ;;  %594 = vmatprep.subr.bf16.mxu1 %v610_v0  ;;  %v613_v3 = vld [vmem:[%s721_s1 + $0x18] sm:$0xff]   ;;  %v618_v4 = vld [vmem:[%s722_s0] sm:$0xff]   ;;  %v615_v7 = vld [vmem:[%s721_s1 + $0x28] sm:$0xff]  }
   0x3   :  { %563 = vmatpush3.bf16.msra.mxu0 %v610_v0  ;;  %602 = vmatpush3.bf16.msra.mxu1 %v610_v0  ;;  %v619_v5 = vld [vmem:[%s722_s0 + $0x20] sm:$0xff]   ;;  %v616_v8 = vld [vmem:[%s721_s1 + $0x30] sm:$0xff]   ;;  %v617_v9 = vld [vmem:[%s721_s1 + $0x38] sm:$0xff]  }
   0x4   :  { %564 = vmatprep.subr.bf16.mxu0 %v611_v1  ;;  %595 = vmatprep.subr.bf16.mxu1 %v611_v1  ;;  %v614_v6 = vld [vmem:[%s721_s1 + $0x20] sm:$0xff]   ;;  %v620_v10 = vld [vmem:[%s722_s0 + $0x8] sm:$0xff]   ;;  %v622_v12 = vld [vmem:[%s722_s0 + $0x10] sm:$0xff]  }
   0x5   :  { %578 = vmatprep.mubr.bf16.mxu0 %v618_v4  ;;  %586 = vmatprep.mubr.bf16.mxu1 %v619_v5  ;;  %v621_v11 = vld [vmem:[%s722_s0 + $0x28] sm:$0xff]   ;;  %v623_v13 = vld [vmem:[%s722_s0 + $0x30] sm:$0xff]   ;;  %v624_v14 = vld [vmem:[%s722_s0 + $0x18] sm:$0xff]  }
   0x6   :  { %v625_v15 = vld [vmem:[%s722_s0 + $0x38] sm:$0xff]   ;;  %v466_v16 = vld [vmem:[%s723_s2] ss:$0 sm:$0xff] }
   0x7   :  { %565 = vmatpush3.bf16.msra.mxu0 %v611_v1  ;;  %603 = vmatpush3.bf16.msra.mxu1 %v611_v1 }
   0x8   :  { %566 = vmatprep.subr.bf16.mxu0 %v612_v2  ;;  %596 = vmatprep.subr.bf16.mxu1 %v612_v2 }
   0xb   :  { %567 = vmatpush3.bf16.msra.mxu0 %v612_v2  ;;  %604 = vmatpush3.bf16.msra.mxu1 %v612_v2 }
   0xc   :  { %568 = vmatprep.subr.bf16.mxu0 %v613_v3  ;;  %597 = vmatprep.subr.bf16.mxu1 %v613_v3 }
   0xf   :  { %569 = vmatpush3.bf16.msra.mxu0 %v613_v3  ;;  %605 = vmatpush3.bf16.msra.mxu1 %v613_v3 }
  0x10   :  { %570 = vmatprep.subr.bf16.mxu0 %v614_v6  ;;  %598 = vmatprep.subr.bf16.mxu1 %v614_v6 }
  0x13   :  { %571 = vmatpush3.bf16.msra.mxu0 %v614_v6  ;;  %606 = vmatpush3.bf16.msra.mxu1 %v614_v6 }
  0x14   :  { %572 = vmatprep.subr.bf16.mxu0 %v615_v7  ;;  %599 = vmatprep.subr.bf16.mxu1 %v615_v7 }
  0x17   :  { %573 = vmatpush3.bf16.msra.mxu0 %v615_v7  ;;  %607 = vmatpush3.bf16.msra.mxu1 %v615_v7 }
  0x18   :  { %574 = vmatprep.subr.bf16.mxu0 %v616_v8  ;;  %600 = vmatprep.subr.bf16.mxu1 %v616_v8 }
  0x1b   :  { %575 = vmatpush3.bf16.msra.mxu0 %v616_v8  ;;  %608 = vmatpush3.bf16.msra.mxu1 %v616_v8 }
  0x1c   :  { %576 = vmatprep.subr.bf16.mxu0 %v617_v9  ;;  %601 = vmatprep.subr.bf16.mxu1 %v617_v9 }
  0x1f   :  { %577 = vmatpush3.bf16.msra.mxu0 %v617_v9  ;;  %609 = vmatpush3.bf16.msra.mxu1 %v617_v9 }
  0x22   :  { %579 = vmatmul.mubr.bf16.vlgmr.msra.gmra.mrb[0].mxu0 %v620_v10  ;;  %587 = vmatmul.mubr.bf16.vlgmr.msra.gmra.mrb[0].mxu1 %v621_v11 }
  0x23   :  { %582 = vmatprep.mubr.bf16.mxu0 %v622_v12  ;;  %590 = vmatprep.mubr.bf16.mxu1 %v623_v13 }
  0x2a   :  { %583 = vmatmul.mubr.bf16.gmra.mrb[4].mxu0 %v624_v14  ;;  %591 = vmatmul.mubr.bf16.gmra.mrb[4].mxu1 %v625_v15 }
  0xf5   :  { %v580_v17 = vpop.f32.mrb[0].mxu0  ;;  %v588_v18 = vpop.f32.mrb[0].mxu1 }
  0xf6   :  { %v336_v19 = vadd.f32 %v580_v17, %v466_v16  ;;  %v344_v20 = vadd.f32 %v588_v18, %v466_v16  ;;  %v213_v21 = vpop.f32.mrb[1].mxu0  ;;  %v245_v22 = vpop.f32.mrb[1].mxu1 }
  0xf7   :  { %v334_v23 = vadd.f32 %v466_v16, %v213_v21  ;;  %v342_v24 = vadd.f32 %v466_v16, %v245_v22  ;;  %v581_v25 = vpop.f32.mrb[2].mxu0  ;;  %v589_v26 = vpop.f32.mrb[2].mxu1 }
  0xf8   :  { %v337_v27 = vadd.f32 %v581_v25, %v466_v16  ;;  %v345_v28 = vadd.f32 %v589_v26, %v466_v16  ;;  %v216_v29 = vpop.f32.mrb[3].mxu0  ;;  %v248_v30 = vpop.f32.mrb[3].mxu1  ;;  %v352_v33 = vmax.f32 %v336_v19, 0.0  ;;  %v360_v34 = vmax.f32 %v344_v20, 0.0 }
  0xf9   :  { %v335_v31 = vadd.f32 %v466_v16, %v216_v29  ;;  %v343_v32 = vadd.f32 %v466_v16, %v248_v30  ;;  %v350_v37 = vmax.f32 %v334_v23, 0.0  ;;  %v358_v38 = vmax.f32 %v342_v24, 0.0 }
  0xfa   :  { %v353_v35 = vmax.f32 %v337_v27, 0.0  ;;  %v361_v36 = vmax.f32 %v345_v28, 0.0 }
  0xfb   :  { %v351_v39 = vmax.f32 %v335_v31, 0.0  ;;  %v359_v40 = vmax.f32 %v343_v32, 0.0 }
  0xfc   :  { %v507_v41 = vpack.c.bf16 %v353_v35, %v352_v33  ;;  %v527_v42 = vpack.c.bf16 %v361_v36, %v360_v34 }
  0xfd   :  { %v502_v43 = vpack.c.bf16 %v351_v39, %v350_v37  ;;  %v522_v44 = vpack.c.bf16 %v359_v40, %v358_v38  ;;  %v584_v45 = vpop.f32.mrb[4].mxu0  ;;  %v592_v46 = vpop.f32.mrb[4].mxu1 }
  0xfe   :  { %539 = vst [vmem:[%s724_s3 + $0x8] sm:$0xff] %v507_v41   ;;  %543 = vst [vmem:[%s724_s3 + $0x28] sm:$0xff] %v527_v42   ;;  %v340_v47 = vadd.f32 %v584_v45, %v466_v16  ;;  %v348_v48 = vadd.f32 %v592_v46, %v466_v16  ;;  %v229_v49 = vpop.f32.mrb[5].mxu0  ;;  %v261_v50 = vpop.f32.mrb[5].mxu1 }
  0xff   :  { %503 = vst [vmem:[%s724_s3] sm:$0xff] %v502_v43   ;;  %542 = vst [vmem:[%s724_s3 + $0x20] sm:$0xff] %v522_v44   ;;  %v338_v51 = vadd.f32 %v466_v16, %v229_v49  ;;  %v346_v52 = vadd.f32 %v466_v16, %v261_v50  ;;  %v585_v53 = vpop.f32.mrb[6].mxu0  ;;  %v593_v54 = vpop.f32.mrb[6].mxu1 }
 0x100   :  { %v341_v55 = vadd.f32 %v585_v53, %v466_v16  ;;  %v349_v56 = vadd.f32 %v593_v54, %v466_v16  ;;  %v232_v57 = vpop.f32.mrb[7].mxu0  ;;  %v264_v58 = vpop.f32.mrb[7].mxu1  ;;  %v356_v61 = vmax.f32 %v340_v47, 0.0  ;;  %v364_v62 = vmax.f32 %v348_v48, 0.0 }
 0x101   :  { %v339_v59 = vadd.f32 %v466_v16, %v232_v57  ;;  %v347_v60 = vadd.f32 %v466_v16, %v264_v58  ;;  %v354_v1 = vmax.f32 %v338_v51, 0.0  ;;  %v362_v2 = vmax.f32 %v346_v52, 0.0 }
 0x102   :  { %v357_v63 = vmax.f32 %v341_v55, 0.0  ;;  %v365_v0 = vmax.f32 %v349_v56, 0.0 }
 0x103   :  { %v355_v3 = vmax.f32 %v339_v59, 0.0  ;;  %v363_v4 = vmax.f32 %v347_v60, 0.0 }
 0x104   :  { %v517_v5 = vpack.c.bf16 %v357_v63, %v356_v61  ;;  %v537_v6 = vpack.c.bf16 %v365_v0, %v364_v62 }
 0x105   :  { %v512_v7 = vpack.c.bf16 %v355_v3, %v354_v1  ;;  %v532_v8 = vpack.c.bf16 %v363_v4, %v362_v2 }
 0x106   :  { %541 = vst [vmem:[%s724_s3 + $0x18] sm:$0xff] %v517_v5   ;;  %545 = vst [vmem:[%s724_s3 + $0x38] sm:$0xff] %v537_v6  }
 0x107   :  { %540 = vst [vmem:[%s724_s3 + $0x10] sm:$0xff] %v512_v7   ;;  %544 = vst [vmem:[%s724_s3 + $0x30] sm:$0xff] %v532_v8  }

// kernel: basic_block_forward.3
= control target key start
LH: loop header
LB: loop body
LE: loop exit
PB: predicated region body
PF: predicated region fallthrough
CT: control target
= control target key end

     0   :  { %s1108_s3 = inlined_call_operand.vmem [shape: bf16[128,128], index: 3, kind: input, shape index: {}]   ;;  %s1109_s1 = inlined_call_operand.vmem [shape: bf16[128,128], index: 1, kind: input, shape index: {}]   ;;  %s1110_s2 = inlined_call_operand.vmem [shape: bf16[128,128], index: 2, kind: input, shape index: {}]   ;;  %s1111_s0 = inlined_call_operand.vmem [shape: bf16[128,128], index: 0, kind: input, shape index: {}]   ;;  %s1112_s4 = inlined_call_operand.vmem [shape: f32[1,128], index: 4, kind: input, shape index: {}]   ;;  %s1113_s5 = inlined_call_operand.vmem [shape: bf16[128,128], index: 5, kind: output, shape index: {}]  }
   0x1   :  { %v905_v0 = vld [vmem:[%s1108_s3] sm:$0xff]   ;;  %v907_v2 = vld [vmem:[%s1108_s3 + $0x8] sm:$0xff]   ;;  %v909_v4 = vld [vmem:[%s1108_s3 + $0x10] sm:$0xff]  }
   0x2   :  { %v906_v1 = vld [vmem:[%s1109_s1] sm:$0xff]   ;;  %825 = vmatprep.subr.bf16.mxu1 %v905_v0  ;;  %v908_v3 = vld [vmem:[%s1109_s1 + $0x8] sm:$0xff]   ;;  %v910_v5 = vld [vmem:[%s1109_s1 + $0x10] sm:$0xff]  }
   0x3   :  { %857 = vmatprep.subr.bf16.mxu0 %v906_v1  ;;  %826 = vmatpush3.bf16.msra.mxu1 %v905_v0  ;;  %v911_v6 = vld [vmem:[%s1108_s3 + $0x18] sm:$0xff]   ;;  %v913_v8 = vld [vmem:[%s1108_s3 + $0x20] sm:$0xff]   ;;  %v915_v10 = vld [vmem:[%s1108_s3 + $0x28] sm:$0xff]  }
   0x4   :  { %858 = vmatpush3.bf16.msra.mxu0 %v906_v1  ;;  %827 = vmatprep.subr.bf16.mxu1 %v907_v2  ;;  %v912_v7 = vld [vmem:[%s1109_s1 + $0x18] sm:$0xff]   ;;  %v914_v9 = vld [vmem:[%s1109_s1 + $0x20] sm:$0xff]   ;;  %v916_v11 = vld [vmem:[%s1109_s1 + $0x28] sm:$0xff]  }
   0x5   :  { %859 = vmatprep.subr.bf16.mxu0 %v908_v3  ;;  %v921_v12 = vld [vmem:[%s1110_s2] sm:$0xff]   ;;  %v917_v14 = vld [vmem:[%s1108_s3 + $0x30] sm:$0xff]   ;;  %v919_v16 = vld [vmem:[%s1108_s3 + $0x38] sm:$0xff]  }
   0x6   :  { %v922_v13 = vld [vmem:[%s1111_s0] sm:$0xff]   ;;  %841 = vmatprep.mubr.bf16.mxu1 %v921_v12  ;;  %v918_v15 = vld [vmem:[%s1109_s1 + $0x30] sm:$0xff]   ;;  %v920_v17 = vld [vmem:[%s1109_s1 + $0x38] sm:$0xff]  }
   0x7   :  { %828 = vmatpush3.bf16.msra.mxu1 %v907_v2  ;;  %873 = vmatprep.mubr.bf16.mxu0 %v922_v13  ;;  %v923_v18 = vld [vmem:[%s1110_s2 + $0x8] sm:$0xff]   ;;  %v925_v20 = vld [vmem:[%s1110_s2 + $0x10] sm:$0xff]   ;;  %v927_v22 = vld [vmem:[%s1110_s2 + $0x18] sm:$0xff]  }
   0x8   :  { %860 = vmatpush3.bf16.msra.mxu0 %v908_v3  ;;  %829 = vmatprep.subr.bf16.mxu1 %v909_v4  ;;  %v924_v19 = vld [vmem:[%s1111_s0 + $0x8] sm:$0xff]   ;;  %v926_v21 = vld [vmem:[%s1111_s0 + $0x10] sm:$0xff]   ;;  %v928_v23 = vld [vmem:[%s1111_s0 + $0x18] sm:$0xff]  }
   0x9   :  { %861 = vmatprep.subr.bf16.mxu0 %v910_v5  ;;  %v929_v24 = vld [vmem:[%s1110_s2 + $0x20] sm:$0xff]   ;;  %v931_v26 = vld [vmem:[%s1110_s2 + $0x28] sm:$0xff]   ;;  %v933_v28 = vld [vmem:[%s1110_s2 + $0x30] sm:$0xff]  }
   0xa   :  { %v930_v25 = vld [vmem:[%s1111_s0 + $0x20] sm:$0xff]   ;;  %v932_v27 = vld [vmem:[%s1111_s0 + $0x28] sm:$0xff]   ;;  %v934_v29 = vld [vmem:[%s1111_s0 + $0x30] sm:$0xff]  }
   0xb   :  { %830 = vmatpush3.bf16.msra.mxu1 %v909_v4  ;;  %v935_v30 = vld [vmem:[%s1110_s2 + $0x38] sm:$0xff]   ;;  %v1066_v34 = vld [vmem:[%s1112_s4] ss:$0 sm:$0xff] }
   0xc   :  { %862 = vmatpush3.bf16.msra.mxu0 %v910_v5  ;;  %831 = vmatprep.subr.bf16.mxu1 %v911_v6  ;;  %v936_v31 = vld [vmem:[%s1111_s0 + $0x38] sm:$0xff]  }
   0xd   :  { %863 = vmatprep.subr.bf16.mxu0 %v912_v7 }
   0xf   :  { %832 = vmatpush3.bf16.msra.mxu1 %v911_v6 }
  0x10   :  { %864 = vmatpush3.bf16.msra.mxu0 %v912_v7  ;;  %833 = vmatprep.subr.bf16.mxu1 %v913_v8 }
  0x11   :  { %865 = vmatprep.subr.bf16.mxu0 %v914_v9 }
  0x13   :  { %834 = vmatpush3.bf16.msra.mxu1 %v913_v8 }
  0x14   :  { %866 = vmatpush3.bf16.msra.mxu0 %v914_v9  ;;  %835 = vmatprep.subr.bf16.mxu1 %v915_v10 }
  0x15   :  { %867 = vmatprep.subr.bf16.mxu0 %v916_v11 }
  0x17   :  { %836 = vmatpush3.bf16.msra.mxu1 %v915_v10 }
  0x18   :  { %868 = vmatpush3.bf16.msra.mxu0 %v916_v11  ;;  %837 = vmatprep.subr.bf16.mxu1 %v917_v14 }
  0x19   :  { %869 = vmatprep.subr.bf16.mxu0 %v918_v15 }
  0x1b   :  { %838 = vmatpush3.bf16.msra.mxu1 %v917_v14 }
  0x1c   :  { %870 = vmatpush3.bf16.msra.mxu0 %v918_v15  ;;  %839 = vmatprep.subr.bf16.mxu1 %v919_v16 }
  0x1d   :  { %871 = vmatprep.subr.bf16.mxu0 %v920_v17 }
  0x1f   :  { %840 = vmatpush3.bf16.msra.mxu1 %v919_v16 }
  0x20   :  { %872 = vmatpush3.bf16.msra.mxu0 %v920_v17 }
  0x22   :  { %842 = vmatmul.mubr.bf16.vlgmr.msra.gmra.mrb[0].mxu1 %v923_v18 }
  0x23   :  { %874 = vmatmul.mubr.bf16.vlgmr.msra.gmra.mrb[0].mxu0 %v924_v19  ;;  %845 = vmatprep.mubr.bf16.mxu1 %v925_v20 }
  0x24   :  { %877 = vmatprep.mubr.bf16.mxu0 %v926_v21 }
  0x2a   :  { %846 = vmatmul.mubr.bf16.gmra.mrb[4].mxu1 %v927_v22 }
  0x2b   :  { %878 = vmatmul.mubr.bf16.gmra.mrb[4].mxu0 %v928_v23  ;;  %849 = vmatprep.mubr.bf16.mxu1 %v929_v24 }
  0x2c   :  { %881 = vmatprep.mubr.bf16.mxu0 %v930_v25 }
  0x32   :  { %850 = vmatmul.mubr.bf16.gmra.mrb[8].mxu1 %v931_v26 }
  0x33   :  { %882 = vmatmul.mubr.bf16.gmra.mrb[8].mxu0 %v932_v27  ;;  %853 = vmatprep.mubr.bf16.mxu1 %v933_v28 }
  0x34   :  { %885 = vmatprep.mubr.bf16.mxu0 %v934_v29 }
  0x3a   :  { %854 = vmatmul.mubr.bf16.gmra.mrb[12].mxu1 %v935_v30 }
  0x3b   :  { %886 = vmatmul.mubr.bf16.gmra.mrb[12].mxu0 %v936_v31 }
  0xf5   :  { %v843_v32 = vpop.f32.mrb[0].mxu1 }
  0xf6   :  { %v875_v33 = vpop.f32.mrb[0].mxu0  ;;  %v187_v35 = vpop.f32.mrb[1].mxu1 }
  0xf7   :  { %v509_v36 = vadd.f32 %v875_v33, %v843_v32  ;;  %v444_v37 = vpop.f32.mrb[1].mxu0  ;;  %v844_v38 = vpop.f32.mrb[2].mxu1 }
  0xf8   :  { %v507_v39 = vadd.f32 %v444_v37, %v187_v35  ;;  %v876_v40 = vpop.f32.mrb[2].mxu0  ;;  %v190_v41 = vpop.f32.mrb[3].mxu1 }
  0xf9   :  { %v567_v42 = vadd.f32 %v1066_v34, %v509_v36  ;;  %v510_v43 = vadd.f32 %v876_v40, %v844_v38  ;;  %v447_v44 = vpop.f32.mrb[3].mxu0 }
  0xfa   :  { %v565_v45 = vadd.f32 %v1066_v34, %v507_v39  ;;  %v508_v46 = vadd.f32 %v447_v44, %v190_v41 }
  0xfb   :  { %v568_v47 = vadd.f32 %v1066_v34, %v510_v43  ;;  %v583_v49 = vmax.f32 %v567_v42, 0.0 }
  0xfc   :  { %v566_v48 = vadd.f32 %v1066_v34, %v508_v46  ;;  %v581_v52 = vmax.f32 %v565_v45, 0.0 }
  0xfd   :  { %v584_v50 = vmax.f32 %v568_v47, 0.0  ;;  %v847_v51 = vpop.f32.mrb[4].mxu1 }
  0xfe   :  { %v582_v53 = vmax.f32 %v566_v48, 0.0  ;;  %v879_v54 = vpop.f32.mrb[4].mxu0  ;;  %v203_v55 = vpop.f32.mrb[5].mxu1 }
  0xff   :  { %v754_v56 = vpack.c.bf16 %v584_v50, %v583_v49  ;;  %v513_v57 = vadd.f32 %v879_v54, %v847_v51  ;;  %v460_v58 = vpop.f32.mrb[5].mxu0  ;;  %v848_v59 = vpop.f32.mrb[6].mxu1 }
 0x100   :  { %v749_v60 = vpack.c.bf16 %v582_v53, %v581_v52  ;;  %v511_v61 = vadd.f32 %v460_v58, %v203_v55  ;;  %v880_v62 = vpop.f32.mrb[6].mxu0  ;;  %v206_v63 = vpop.f32.mrb[7].mxu1 }
 0x101   :  { %786 = vst [vmem:[%s1113_s5 + $0x8] sm:$0xff] %v754_v56   ;;  %v571_v0 = vadd.f32 %v1066_v34, %v513_v57  ;;  %v514_v1 = vadd.f32 %v880_v62, %v848_v59  ;;  %v463_v2 = vpop.f32.mrb[7].mxu0 }
 0x102   :  { %750 = vst [vmem:[%s1113_s5] sm:$0xff] %v749_v60   ;;  %v569_v3 = vadd.f32 %v1066_v34, %v511_v61  ;;  %v512_v4 = vadd.f32 %v463_v2, %v206_v63 }
 0x103   :  { %v572_v5 = vadd.f32 %v1066_v34, %v514_v1  ;;  %v587_v7 = vmax.f32 %v571_v0, 0.0 }
 0x104   :  { %v570_v6 = vadd.f32 %v1066_v34, %v512_v4  ;;  %v585_v10 = vmax.f32 %v569_v3, 0.0 }
 0x105   :  { %v588_v8 = vmax.f32 %v572_v5, 0.0  ;;  %v851_v9 = vpop.f32.mrb[8].mxu1 }
 0x106   :  { %v586_v11 = vmax.f32 %v570_v6, 0.0  ;;  %v883_v12 = vpop.f32.mrb[8].mxu0  ;;  %v219_v13 = vpop.f32.mrb[9].mxu1 }
 0x107   :  { %v764_v14 = vpack.c.bf16 %v588_v8, %v587_v7  ;;  %v517_v15 = vadd.f32 %v883_v12, %v851_v9  ;;  %v476_v16 = vpop.f32.mrb[9].mxu0  ;;  %v852_v17 = vpop.f32.mrb[10].mxu1 }
 0x108   :  { %v759_v18 = vpack.c.bf16 %v586_v11, %v585_v10  ;;  %v515_v19 = vadd.f32 %v476_v16, %v219_v13  ;;  %v884_v20 = vpop.f32.mrb[10].mxu0  ;;  %v222_v21 = vpop.f32.mrb[11].mxu1 }
 0x109   :  { %788 = vst [vmem:[%s1113_s5 + $0x18] sm:$0xff] %v764_v14   ;;  %v575_v22 = vadd.f32 %v1066_v34, %v517_v15  ;;  %v518_v23 = vadd.f32 %v884_v20, %v852_v17  ;;  %v479_v24 = vpop.f32.mrb[11].mxu0 }
 0x10a   :  { %787 = vst [vmem:[%s1113_s5 + $0x10] sm:$0xff] %v759_v18   ;;  %v573_v25 = vadd.f32 %v1066_v34, %v515_v19  ;;  %v516_v26 = vadd.f32 %v479_v24, %v222_v21 }
 0x10b   :  { %v576_v27 = vadd.f32 %v1066_v34, %v518_v23  ;;  %v591_v29 = vmax.f32 %v575_v22, 0.0 }
 0x10c   :  { %v574_v28 = vadd.f32 %v1066_v34, %v516_v26  ;;  %v589_v32 = vmax.f32 %v573_v25, 0.0 }
 0x10d   :  { %v592_v30 = vmax.f32 %v576_v27, 0.0  ;;  %v855_v31 = vpop.f32.mrb[12].mxu1 }
 0x10e   :  { %v590_v33 = vmax.f32 %v574_v28, 0.0  ;;  %v887_v35 = vpop.f32.mrb[12].mxu0  ;;  %v235_v36 = vpop.f32.mrb[13].mxu1 }
 0x10f   :  { %v774_v37 = vpack.c.bf16 %v592_v30, %v591_v29  ;;  %v521_v38 = vadd.f32 %v887_v35, %v855_v31  ;;  %v492_v39 = vpop.f32.mrb[13].mxu0  ;;  %v856_v40 = vpop.f32.mrb[14].mxu1 }
 0x110   :  { %v769_v41 = vpack.c.bf16 %v590_v33, %v589_v32  ;;  %v519_v42 = vadd.f32 %v492_v39, %v235_v36  ;;  %v888_v43 = vpop.f32.mrb[14].mxu0  ;;  %v238_v44 = vpop.f32.mrb[15].mxu1 }
 0x111   :  { %790 = vst [vmem:[%s1113_s5 + $0x28] sm:$0xff] %v774_v37   ;;  %v579_v45 = vadd.f32 %v1066_v34, %v521_v38  ;;  %v522_v46 = vadd.f32 %v888_v43, %v856_v40  ;;  %v495_v47 = vpop.f32.mrb[15].mxu0 }
 0x112   :  { %789 = vst [vmem:[%s1113_s5 + $0x20] sm:$0xff] %v769_v41   ;;  %v577_v48 = vadd.f32 %v1066_v34, %v519_v42  ;;  %v520_v49 = vadd.f32 %v495_v47, %v238_v44 }
 0x113   :  { %v580_v50 = vadd.f32 %v1066_v34, %v522_v46  ;;  %v595_v52 = vmax.f32 %v579_v45, 0.0 }
 0x114   :  { %v578_v51 = vadd.f32 %v1066_v34, %v520_v49  ;;  %v593_v54 = vmax.f32 %v577_v48, 0.0 }
 0x115   :  { %v596_v53 = vmax.f32 %v580_v50, 0.0 }
 0x116   :  { %v594_v55 = vmax.f32 %v578_v51, 0.0 }
 0x117   :  { %v784_v56 = vpack.c.bf16 %v596_v53, %v595_v52 }
 0x118   :  { %v779_v57 = vpack.c.bf16 %v594_v55, %v593_v54 }
 0x119   :  { %792 = vst [vmem:[%s1113_s5 + $0x38] sm:$0xff] %v784_v56  }
 0x11a   :  { %791 = vst [vmem:[%s1113_s5 + $0x30] sm:$0xff] %v779_v57  }

</bundles_post_ra>
